<compile_context>
chip_gen: v5e
topology: v5e:2x2
jax: 0.10.0
libtpu: 0.0.40
codegen_flags: <defaults>
</compile_context>

<pallas_src>
import functools
import math

import jax
import jax.numpy as jnp
from jax.experimental import pallas as pl
from jax.experimental.pallas import tpu as pltpu

RMS_EPS = 1e-8


def _round_up(x, m):
    return ((x + m - 1) // m) * m


def _default_vmem_limit_bytes():
    # ~75% of physical VMEM (leaves headroom on v7x's 64 MiB), capped at 96 MiB.
    try:
        cap = pltpu.get_tpu_info().vmem_capacity_bytes
    except Exception:
        cap = 64 * 1024 * 1024
    return int(min(cap * 3 // 4, 96 * 1024 * 1024))


def _rmsnorm_kernel(*refs, d, p, eps, has_bias):
    """Grid = (row_tiles,). Each step normalizes one (row_tile, H) block."""
    if has_bias:
        x_ref, scale_ref, offset_ref, o_ref = refs
    else:
        x_ref, scale_ref, o_ref = refs
        offset_ref = None

    x = x_ref[...].astype(jnp.float32)             # (row_tile, H) in f32
    scale = scale_ref[...].astype(jnp.float32)     # (1, H), broadcast over rows

    if 0.0 <= p <= 1.0:
        # Partial RMSNorm: norm over the first int(d * p) features only.
        d_x = int(d * p)
        col = jax.lax.broadcasted_iota(jnp.int32, x.shape, dimension=1)
        sq = jnp.where(col < d_x, x * x, 0.0)
    else:
        d_x = d
        sq = x * x

    rms = jnp.sqrt(jnp.sum(sq, axis=-1, keepdims=True)) * (d_x ** -0.5)
    y = scale * (x / (rms + eps))
    if has_bias:
        y = y + offset_ref[...].astype(jnp.float32)
    o_ref[...] = y.astype(o_ref.dtype)


def rms_norm(x, scale, offset=None, *, p=-1.0, eps=RMS_EPS, row_tile_cap=1024):
    """RMSNorm forward. x: [..., H]; scale: [H]; offset: optional [H] (bias=True)."""
    orig_shape = x.shape
    H = orig_shape[-1]
    x2d = x.reshape(-1, H)
    rows = x2d.shape[0]

    # Sublane packing granularity: 8 rows for 32-bit dtypes, 16 for bf16, 32 for int8.
    itemsize = jnp.dtype(x.dtype).itemsize
    sub = max(8, 32 // max(itemsize, 1))

    vmem_limit = _default_vmem_limit_bytes()
    # x + out blocks, each double-buffered by the pipeline; keep them inside ~half
    # of the VMEM budget (rest is headroom for Mosaic internal scratch).
    per_row_bytes = 2 * 2 * H * itemsize
    rows_by_vmem = max(sub, ((vmem_limit // 2) // max(per_row_bytes, 1)) // sub * sub)

    # Row tile: as large as VMEM / the problem allows (memory-bound op), but
    # sublane-aligned and not overshooting the actual row count by more than
    # one sublane group (minimizes padding waste).
    row_tile = min(row_tile_cap, rows_by_vmem, _round_up(rows, sub))
    row_tile = max(sub, (row_tile // sub) * sub)

    # v7x megacore: guarantee >= 2 row tiles when the problem has enough rows so
    # the "parallel" axis shards across both TensorCores.
    if _round_up(rows, row_tile) // row_tile < 2 and rows > sub:
        row_tile = max(sub, _round_up(-(-rows // 2), sub))

    padded_rows = _round_up(rows, row_tile)
    if padded_rows != rows:
        x2d = jnp.pad(x2d, ((0, padded_rows - rows), (0, 0)))  # zero rows are safe

    has_bias = offset is not None
    inputs = [x2d, scale.reshape(1, H)]
    in_specs = [
        pl.BlockSpec((row_tile, H), lambda i: (i, 0)),   # x rows (lane-dense H)
        pl.BlockSpec((1, H), lambda i: (0, 0)),          # RMSNorm scale
    ]
    if has_bias:
        inputs.append(offset.reshape(1, H))
        in_specs.append(pl.BlockSpec((1, H), lambda i: (0, 0)))   # offset / bias

    kernel = functools.partial(_rmsnorm_kernel, d=H, p=p, eps=eps, has_bias=has_bias)

    out = pl.pallas_call(
        kernel,
        out_shape=jax.ShapeDtypeStruct((padded_rows, H), x.dtype),
        grid=(padded_rows // row_tile,),
        in_specs=in_specs,
        out_specs=pl.BlockSpec((row_tile, H), lambda i: (i, 0)),
        compiler_params=pltpu.CompilerParams(
            dimension_semantics=("parallel",),
            vmem_limit_bytes=vmem_limit,
        ),
    )(*inputs)

    if padded_rows != rows:
        out = out[:rows]
    return out.reshape(orig_shape)


def _reference(x, scale, offset=None, *, p=-1.0, eps=RMS_EPS):
    xf = x.astype(jnp.float32)
    d = xf.shape[-1]
    if 0.0 <= p <= 1.0:
        d_x = int(d * p)
        norm_x = jnp.linalg.norm(xf[..., :d_x], axis=-1, keepdims=True)
    else:
        d_x = d
        norm_x = jnp.linalg.norm(xf, axis=-1, keepdims=True)
    rms_x = norm_x * d_x ** (-0.5)
    y = scale.astype(jnp.float32) * (xf / (rms_x + eps))
    if offset is not None:
        y = y + offset.astype(jnp.float32)
    return y.astype(x.dtype)


if __name__ == "__main__":
    batch, seq, hidden = 2, 8, 32

    key = jax.random.PRNGKey(0)
    k_x, k_s, k_o = jax.random.split(key, 3)

    x = jax.random.normal(k_x, (batch, seq, hidden), dtype=jnp.float32)
    # scale is initialized to ones in the module; perturb it so the multiply is exercised.
    scale = 1.0 + 0.1 * jax.random.normal(k_s, (hidden,), dtype=jnp.float32)

    # Default module config: p = -1.0 (full-width norm), bias = False.
    out = jax.block_until_ready(rms_norm(x, scale))
    ref = _reference(x, scale)
    assert out.shape == x.shape
    assert jnp.allclose(out, ref, atol=1e-4, rtol=1e-4), "default RMSNorm mismatch"

    # Non-default branches: partial RMSNorm (p = 0.5) + bias term.
    offset = 0.05 * jax.random.normal(k_o, (hidden,), dtype=jnp.float32)
    out_p = jax.block_until_ready(rms_norm(x, scale, offset, p=0.5))
    ref_p = _reference(x, scale, offset, p=0.5)
    assert jnp.allclose(out_p, ref_p, atol=1e-4, rtol=1e-4), "partial RMSNorm mismatch"

    print("KERNEL_OK")
</pallas_src>

<mosaic_0001>
module attributes {stable_mosaic.version = 11 : i64} {
  func.func @_rmsnorm_kernel(%arg0: i32, %arg1: memref<8x32xf32, #tpu.memory_space<vmem>>, %arg2: memref<1x32xf32, #tpu.memory_space<vmem>>, %arg3: memref<8x32xf32, #tpu.memory_space<vmem>>) attributes {dimension_semantics = [#tpu.dimension_semantics<parallel>], iteration_bounds = array<i64: 2>, scalar_prefetch = 0 : i64, scratch_operands = 0 : i64, tpu.core_type = #tpu.core_type<tc>, window_params = [{transform_indices = @transform_0, window_bounds = array<i64: 8, 32>}, {pipeline_mode = #tpu.pipeline_mode<synchronous>, transform_indices = @transform_1, window_bounds = array<i64: 1, 32>}, {transform_indices = @transform_2, window_bounds = array<i64: 8, 32>}]} {
    %c0 = arith.constant 0 : index
    %c0_0 = arith.constant 0 : index
    %0 = vector.load %arg1[%c0, %c0_0] : memref<8x32xf32, #tpu.memory_space<vmem>>, vector<8x32xf32>
    %c0_1 = arith.constant 0 : index
    %c0_2 = arith.constant 0 : index
    %1 = vector.load %arg2[%c0_1, %c0_2] : memref<1x32xf32, #tpu.memory_space<vmem>>, vector<1x32xf32>
    %2 = arith.mulf %0, %0 : vector<8x32xf32>
    %cst = arith.constant dense<0.000000e+00> : vector<8xf32>
    %3 = vector.multi_reduction <add>, %2, %cst [1] : vector<8x32xf32> to vector<8xf32>
    %4 = vector.shape_cast %3 : vector<8xf32> to vector<8x1xf32>
    %5 = math.sqrt %4 : vector<8x1xf32>
    %cst_3 = arith.constant 0.176776692 : f32
    %6 = vector.broadcast %cst_3 : f32 to vector<8x1xf32>
    %7 = arith.mulf %5, %6 : vector<8x1xf32>
    %cst_4 = arith.constant 9.99999993E-9 : f32
    %8 = vector.broadcast %cst_4 : f32 to vector<8x1xf32>
    %9 = arith.addf %7, %8 : vector<8x1xf32>
    %10 = vector.broadcast %9 : vector<8x1xf32> to vector<8x32xf32>
    %11 = arith.divf %0, %10 : vector<8x32xf32>
    %12 = vector.broadcast %1 : vector<1x32xf32> to vector<8x32xf32>
    %13 = arith.mulf %12, %11 : vector<8x32xf32>
    %c0_5 = arith.constant 0 : index
    %c0_6 = arith.constant 0 : index
    %14 = vector.load %arg3[%c0_5, %c0_6] : memref<8x32xf32, #tpu.memory_space<vmem>>, vector<8x32xf32>
    tpu.vector_store %arg3[%c0_5, %c0_6], %13 {strides = array<i32>} : memref<8x32xf32, #tpu.memory_space<vmem>>, vector<8x32xf32>,
    return
  }
  func.func @transform_0(%arg0: i32) -> (i32, i32) {
    %c0_i32 = arith.constant 0 : i32
    %c0_i32_0 = arith.constant 0 : i32
    return %arg0, %c0_i32 : i32, i32
  }
  func.func @transform_1(%arg0: i32) -> (i32, i32) {
    %c0_i32 = arith.constant 0 : i32
    %c0_i32_0 = arith.constant 0 : i32
    %c0_i32_1 = arith.constant 0 : i32
    return %c0_i32, %c0_i32_0 : i32, i32
  }
  func.func @transform_2(%arg0: i32) -> (i32, i32) {
    %c0_i32 = arith.constant 0 : i32
    %c0_i32_0 = arith.constant 0 : i32
    return %arg0, %c0_i32 : i32, i32
  }
}

</mosaic_0001>

<bundles_post_ra>
// kernel: tpu_custom_call.1
= control target key start
LH: loop header
LB: loop body
LE: loop exit
PB: predicated region body
PF: predicated region fallthrough
CT: control target
= control target key end

     0   :  { %7 = vsyncpa [#allocation3], 0  ;;  %s681_s0 = inlined_call_operand.hbm [shape: f32[16,32], index: 0, kind: input, shape index: {}]   ;;  %s682_s1 = inlined_call_operand.hbm [shape: f32[1,32], index: 1, kind: input, shape index: {}]   ;;  %s683_s2 = inlined_call_operand.hbm [shape: f32[16,32], index: 2, kind: output, shape index: {}]  }
   0x1   :  { %9 = vsyncpa [#allocation3 + $0x1], 0 }
   0x2   :  { %10 = vsyncpa [#allocation6], 0 }
   0x3   :  { %11 = vsyncpa [#allocation4], 0 }
   0x4   :  { %13 = vsyncpa [#allocation4 + $0x1], 0  ;;  %s537_s9 = smov 0   ;;  %s539_s10 = smov 0  }
   0x5   :  { %s541_s11 = smov 0   ;;  %s543_s12 = smov 0  }
   0x6 LB: > { %s558_s13 = sadd.s32 4294967295, %s519_s12   ;;  %s313_s14 = sadd.s32 4294967294, %s519_s12   ;;  %s519_s12 = sphi %s543_s12, %s693_s12   ;;  %s515_s11 = sphi %s541_s11, %s692_s11   ;;  %s511_s10 = sphi %s539_s10, %s691_s10   ;;  %s507_s9 = sphi %s537_s9, %s690_s9  }
   0x7   : > { %p39_p0 = scmp.ne.s32.totalorder %s511_s10, %s507_s9  ;;  %p40_p1 = scmp.eq.s32.totalorder %s558_s13, 0 }
   0x8   : > { %p84_p2 = scmp.eq.s32.totalorder %s558_s13, 1  ;;  %p90_p3 = scmp.eq.s32.totalorder %s313_s14, 1 }
   0x9   : > { %p567_p4 = por %p40_p1, %p39_p0  ;;  %p314_p5 = scmp.ge.s32.totalorder %s519_s12, 1 }
   0xa   : > { %p572_p6 = por %p90_p3, %p39_p0  ;;  %p97_p7 = scmp.lt.s32.totalorder %s519_s12, 3 }
   0xb   : > { %s109_s19 = sshll.u32 %s682_s1, 4  ;;  %s521_s21 = smov [#allocation5]   ;;  %s110_s19 = int_to_ptr.hbm [resolvable:$true] %s109_s19 }
   0xc   : > { %p580_p8 = pnand %p314_p5, %p97_p7  ;;  %s111_s22 = sshll.u32 %s521_s21, 4  ;;  %s112_s22 = int_to_ptr.vmem [resolvable:$true] %s111_s22 }
   0xd   : > { %s590_s23 = sadd.s32 1, %s519_s12   ;;  %s26_s24 = sadd.s32 1, %s515_s11 }
   0xe   : > { %p335_p10 = pneg %p580_p8  ;;  %s23_s25 = ssub.s32 %s519_s12, %s590_s23 }
   0xf   : > { %p24_p12 = scmp.eq.s32.totalorder %s23_s25, 0  ;;  %p33_p13 = scmp.ne.s32.totalorder %s515_s11, %s511_s10 }
  0x10   : > { %p336_p11 = pnand %p335_p10, %p40_p1  ;;  %p34_p0 = scmp.eq.s32.totalorder %s519_s12, 0 }
  0x11   : > { %s599_s26 = scalar_select %p24_p12, %s515_s11, %s26_s24  }
  0x12   : > { %338 = dma.hbm_to_vmem [thread:$0]  (!%p336_p11), %s110_s19, 16, %s112_s22, [#allocation6]  }
  0x13   : > { %p603_p3 = por %p84_p2, %p33_p13  ;;  %p348_p5 = scmp.lt.s32.totalorder %s519_s12, 2 }
  0x14   : > { %s122_s28 = sand.u32 1, %s515_s11   ;;  %s318_s29 = sshll.u32 %s519_s12, 3 }
  0x15   : > { %p35_p7 = por %p34_p0, %p33_p13  ;;  %s317_s30 = sshll.u32 %s122_s28, 3 }
  0x16   : > { %s130_s5 = scalar_lea.hbm %s681_s0, %s318_s29  ;;  %s126_s7 = scalar_lea.vmem [#allocation2], %s317_s30 }
  0x17   : > { %s132_s6 = sshll.u32 %s130_s5, 4  ;;  %s134_s8 = sshll.u32 %s126_s7, 4  ;;  %s133_s6 = int_to_ptr.hbm [resolvable:$true] %s132_s6  ;;  %s135_s8 = int_to_ptr.vmem [resolvable:$true] %s134_s8 }
  0x18   : > { %p613_p10 = pnand %p348_p5, %p35_p7  ;;  %s123_s17 = scalar_lea.sflag [#allocation3], %s122_s28 }
  0x19   : > { %s419_s18 = sshra.s32 %s133_s6, 4  ;;  %s426_s24 = scalar_lea.hbm %s681_s0, 16  ;;  %s420_s18 = int_to_ptr.hbm [resolvable:$true] %s419_s18 }
  0x1a   : > { %s421_s19 = scalar_lea.hbm %s420_s18, 8  ;;  %p423_p11 = pneg %p613_p10 }
  0x1b   : > { %p422_p2 = scmp.ne.s32.totalorder %s420_s18, %s421_s19  ;;  %p427_p0 = scmp.lt.s32.totalorder %s420_s18, %s681_s0 }
  0x1c   : > { %p428_p5 = scmp.lt.s32.totalorder %s426_s24, %s421_s19 }
  0x1d   : > { %p424_p12 = pnand %p423_p11, %p422_p2 }
  0x1e   : > { %p429_p7 = por %p428_p5, %p427_p0 }
  0x1f   : > { %p425_p13 = pneg %p424_p12 }
  0x21   : > { %p430_p9 = pnand %p429_p7, %p425_p13 }
  0x23   : > { %433 = shalt.err (!%p430_p9)
}
  0x24   : > { %342 = dma.hbm_to_vmem [thread:$0]  (!%p613_p10), %s133_s6, 128, %s135_s8, %s123_s17  }
  0x25   : > { %143 = sbr.rel (%p580_p8) target bundleno = 214 (0xd6), region = 28  ;;  %s630_s28 = sand.u32 (!%p580_p8), 1, %s511_s10  }
  0x26   : > { %s320_s30 = sshll.u32 (!%p580_p8), %s630_s28, 3  ;;  %s146_s3 = scalar_lea.sflag (!%p580_p8), [#allocation3], %s630_s28 }
  0x27   : > { %s149_s4 = scalar_lea.vmem (!%p580_p8), [#allocation2], %s320_s30 }
  0x2a   : > { %494 = dma.done.wait (%p567_p4), %s146_s3, 128  }
  0x2b   : > { %496 = vsyncadd (%p567_p4), %s146_s3, 4294967168 }
  0x2c   : > { %498 = dma.done.wait (%p40_p1), [#allocation6], 16  }
  0x2d   : > { %500 = vsyncadd (%p40_p1), [#allocation6], 4294967280  ;;  %v176_v0 = vld [vmem:[%s149_s4] sm:$0xff]  ;;  %vm179_vm0 = vcmask 261120   ;;  %s324_s15 = sshll.u32 %s558_s13, 3  ;;  %s175_s7 = scalar_lea.vmem [#allocation7], %s320_s30 }
  0x2e   : > { %v178_v1 = vmul.f32 %v176_v0, %v176_v0  ;;  %s228_s6 = scalar_lea.hbm %s683_s2, %s324_s15  ;;  %v384_v25 = vld [vmem:[#allocation5] ss:$0 sm:$0xff]  ;;  %s230_s13 = sshll.u32 %s175_s7, 4  ;;  %s231_s13 = int_to_ptr.vmem [resolvable:$true] %s230_s13 }
  0x2f   : > { %s232_s8 = sshll.u32 %s228_s6, 4  ;;  %s218_s14 = scalar_lea.sflag [#allocation4], %s630_s28  ;;  %s233_s8 = int_to_ptr.hbm [resolvable:$true] %s232_s8 }
  0x30   : > { %v180_v2 = vsel %vm179_vm0, %v178_v1, 0.0  ;;  %s463_s17 = sshra.s32 %s233_s8, 4  ;;  %s469_s22 = scalar_lea.hbm %s683_s2, 16  ;;  %s464_s17 = int_to_ptr.hbm [resolvable:$true] %s463_s17 }
  0x31   : > { %181 = vadd.xlane.f32.xlu0 %v180_v2  ;;  %s465_s18 = scalar_lea.hbm %s464_s17, 8  ;;  %p470_p9 = scmp.lt.s32.totalorder %s464_s17, %s683_s2 }
  0x32   : > { %p466_p1 = scmp.ne.s32.totalorder %s464_s17, %s465_s18  ;;  %p471_p10 = scmp.lt.s32.totalorder %s469_s22, %s465_s18 }
  0x34   : > { %p467_p4 = pnand %p466_p1, %p603_p3  ;;  %p472_p2 = por %p471_p10, %p470_p9 }
  0x36   : > { %p468_p8 = pneg %p467_p4 }
  0x38   : > { %p473_p11 = pnand %p472_p2, %p468_p8 }
  0xa4   : > { %v182_v3 = vpop.xlane.xlu0 %181 }
  0xa5   : > { %385 = vrsqrt.f32 %v182_v3  ;;  %vm190_vm1 = vcmp.eq.f32.partialorder %v182_v3, inf  ;;  %v193_v11 = vand.u32 2147483648, %v182_v3  ;;  %vm192_vm2 = vcmp.eq.f32.partialorder %v182_v3, 0.0 }
  0xab   : > { %v386_v4 = vpop.eup %385 }
  0xac   : > { %v184_v5 = vmul.f32 %v386_v4, %v182_v3 }
  0xae   : > { %v185_v6 = vmul.f32 %v386_v4, %v184_v5 }
  0xb0   : > { %v186_v7 = vmul.f32 0.5, %v185_v6 }
  0xb2   : > { %v187_v8 = vsub.f32 1.5, %v186_v7 }
  0xb4   : > { %v188_v9 = vmul.f32 %v386_v4, %v187_v8 }
  0xb6   : > { %v189_v10 = vmul.f32 %v188_v9, %v182_v3 }
  0xb8   : > { %v191_v12 = vsel %vm190_vm1, %v182_v3, %v189_v10 }
  0xb9   : > { %v194_v13 = vsel %vm192_vm2, %v193_v11, %v191_v12 }
  0xba   : > { %v195_v14 = vmul.f32 0.17677669, %v194_v13 }
  0xbc   : > { %v196_v15 = vadd.f32 1e-08, %v195_v14 }
  0xbe   : > { %387 = vrcp.f32 %v196_v15  ;;  %v208_v19 = vand.u32 2147483648, %v196_v15  ;;  %v206_v21 = vand.u32 2147483647, %v196_v15  ;;  %vm202_vm4 = vweird.f32 %v196_v15 }
  0xc0   : > { %v209_v23 = vor.u32 1.1754944e-38, %v208_v19  ;;  %vm207_vm6 = vcmp.eq.f32.partialorder %v206_v21, 8.507059e+37 }
  0xc4   : > { %v388_v16 = vpop.eup %387 }
  0xc5   : > { %v198_v17 = vmul.f32 %v388_v16, %v196_v15  ;;  %vm203_vm3 = vweird.f32 %v388_v16 }
  0xc6   : > { %vm204_vm5 = vmor %vm202_vm4, %vm203_vm3 }
  0xc7   : > { %v199_v18 = vsub.f32 1.0, %v198_v17 }
  0xc9   : > { %v200_v20 = vmul.f32 %v388_v16, %v199_v18 }
  0xcb   : > { %v201_v22 = vadd.f32 %v388_v16, %v200_v20 }
  0xcd   : > { %v205_v24 = vsel %vm204_vm5, %v388_v16, %v201_v22 }
  0xce   : > { %v210_v26 = vsel %vm207_vm6, %v209_v23, %v205_v24 }
  0xcf   : > { %v211_v27 = vmul.f32 %v210_v26, %v176_v0 }
  0xd1   : > { %v215_v28 = vmul.f32 %v384_v25, %v211_v27 }
  0xd3   : > { %216 = vst.msk [vmem:[%s175_s7] sm:$0xff] %vm179_vm0, %v215_v28 }
  0xd4   : > { %476 = shalt.err (!%p473_p11)
}
  0xd5   : > { %333 = dma.vmem_to_hbm [thread:$0]  (%p603_p3), %s231_s13, 128, %s233_s8, %s218_s14  }
  0xd6 PF: > { %s244_s29 = sand.u32 1, %s507_s9   ;;  %p689_p12 = scmp.ge.s32.totalorder %s519_s12, 2 }
  0xd7   : > { %s245_s28 = scalar_lea.sflag [#allocation4], %s244_s29 }
  0xd8   : > { %p344_p13 = pnand %p689_p12, %p572_p6 }
  0xda   : > { %p345_p0 = pneg %p344_p13 }
  0xdc   : > { %502 = dma.done.wait (%p345_p0), %s245_s28, 128  }
  0xdd   : > { %504 = vsyncadd (%p345_p0), %s245_s28, 4294967168  ;;  %p16_p5 = scmp.ge.s32.totalorder %s590_s23, 4   ;;  %s690_s9 = smov %s511_s10 }
  0xde   : > { %s691_s10 = smov %s515_s11  ;;  %s692_s11 = smov %s599_s26 }
  0xdf   : > { %s693_s12 = smov %s590_s23  ;;  %18 = sbr.rel (!%p16_p5) target bundleno = 6 (0x6), region = 77 }
  0xe4   :  { %251 = vsyncpa [#allocation3], 1 }
  0xe5   :  { %253 = vsyncpa [#allocation3 + $0x1], 1 }
  0xe6   :  { %254 = vsyncpa [#allocation6], 1 }
  0xe7   :  { %255 = vsyncpa [#allocation4], 1 }
  0xe8   :  { %257 = vsyncpa [#allocation4 + $0x1], 1 }

</bundles_post_ra>
